<compile_context>
chip_gen: v7x
topology: tpu7x:2x2x1
jax: 0.10.0
libtpu: 0.0.40
codegen_flags: <defaults>
</compile_context>

<pallas_src>
import functools

import jax
import jax.numpy as jnp
from jax import lax
from jax.experimental import pallas as pl
from jax.experimental.pallas import tpu as pltpu

_LANE = 128
_MAX_BLOCK_ROWS = 4096  # (4096,128) f32 = 2 MiB per buffer; 4 MiB double-buffered


def _round_down(x, m):
    return (x // m) * m


def _num_tensorcores():
    """Best-effort TensorCore-per-chip query; falls back to 1 (always safe)."""
    get_info = getattr(pltpu, "get_tpu_info", None)
    if get_info is None:
        return 1
    try:
        info = get_info()
    except Exception:
        return 1
    for name in ("num_tensorcores", "tensorcores_per_chip", "tensor_cores_per_chip",
                 "num_cores_per_chip"):
        n = getattr(info, name, None)
        if isinstance(n, int) and 1 <= n <= 8:
            return min(n, 2)
    return 1


def _gen_loss_kernel(x_ref, o_ref, *, rows, block_rows, steps_per_core,
                     acc_rows, needs_mask):
    """Accumulate sum(log(1 - x)) for this core's blocks into its output block."""
    c = pl.program_id(0)   # core / partial-sum index
    i = pl.program_id(1)   # reduction step within this core

    @pl.when(i == 0)
    def _init():
        o_ref[...] = jnp.zeros_like(o_ref)

    def _accum(vals):
        # vreg-aligned partial sums: (block_rows,128) -> (n, acc_rows, 128) -> sum over n.
        # acc_rows/8 independent (8,128)-vreg add chains expose VALU ILP; no per-step
        # cross-lane XLU reduce (that happens once, in plain JAX, on the tiny output).
        o_ref[...] += vals.reshape(block_rows // acc_rows, acc_rows, _LANE).sum(axis=0)

    if not needs_mask:
        # Fully aligned case: unmasked fast path only (no iota / compare / select).
        _accum(jnp.log(1.0 - x_ref[...].astype(jnp.float32)))
    else:
        row0 = (c * steps_per_core + i) * block_rows

        # Fully-clamped duplicate blocks (multi-core split with odd block count)
        # skip all EUP/VPU work.
        @pl.when(row0 < rows)
        def _compute():
            x = x_ref[...].astype(jnp.float32)

            @pl.when(row0 + block_rows <= rows)
            def _fast():
                _accum(jnp.log(1.0 - x))

            @pl.when(row0 + block_rows > rows)
            def _ragged():
                # Only the single ragged edge block pays for the row mask.
                rid = row0 + lax.broadcasted_iota(jnp.int32, (block_rows, _LANE), 0)
                _accum(jnp.where(rid < rows, jnp.log(1.0 - x), 0.0))


def generator_loss(p_g):
    """JAX/Pallas equivalent of the PyTorch generator_loss module forward."""
    total = int(p_g.size)
    flat = p_g.reshape(-1)  # collapsing reshape: free, no HBM copy

    itemsize = jnp.dtype(p_g.dtype).itemsize
    # (8,128) f32 / (16,128) bf16 / (32,128) int8-fp8 packing minimums.
    row_align = max(8, 32 // max(int(itemsize), 1))

    main_rows = total // _LANE
    tail = total - main_rows * _LANE

    # Tiny inputs: a kernel launch is pure overhead and an aligned block can't be formed.
    if main_rows < row_align:
        return jnp.sum(jnp.log(1.0 - flat.astype(jnp.float32))) / jnp.float32(total)

    if tail:
        # Rare ragged case: kernel gets the lane-aligned prefix, the (<128-element)
        # tail is folded in with plain JAX — jnp.pad (full padded copy) is never hit.
        x2d = flat[: main_rows * _LANE].reshape(main_rows, _LANE)
        tail_sum = jnp.sum(jnp.log(1.0 - flat[main_rows * _LANE:].astype(jnp.float32)))
    else:
        x2d = flat.reshape(main_rows, _LANE)  # free reshape, zero-copy path
        tail_sum = None

    rows = main_rows
    block_rows = min(_MAX_BLOCK_ROWS, _round_down(rows, row_align))
    num_blocks = pl.cdiv(rows, block_rows)

    ncores_hw = _num_tensorcores()
    num_cores = ncores_hw if (ncores_hw > 1 and num_blocks >= ncores_hw) else 1
    steps_per_core = pl.cdiv(num_blocks, num_cores)

    # Widest accumulator that divides the block: up to 4 interleaved (8,128) chains.
    acc_rows = 32 if block_rows % 32 == 0 else (16 if block_rows % 16 == 0 else 8)
    needs_mask = (rows % block_rows != 0) or (num_cores * steps_per_core > num_blocks)

    kernel = functools.partial(
        _gen_loss_kernel,
        rows=rows,
        block_rows=block_rows,
        steps_per_core=steps_per_core,
        acc_rows=acc_rows,
        needs_mask=needs_mask,
    )

    def in_map(c, i):
        # Clamp so an over-hanging step on the last core never maps past the array;
        # such duplicated blocks are skipped inside the kernel.
        return (jnp.minimum(c * steps_per_core + i, num_blocks - 1), 0)

    if num_cores > 1:
        core_sem = getattr(pltpu, "CORE_PARALLEL", pltpu.PARALLEL)
        dim_sems = (core_sem, pltpu.ARBITRARY)
    else:
        dim_sems = (pltpu.ARBITRARY, pltpu.ARBITRARY)

    partials = pl.pallas_call(
        kernel,
        out_shape=jax.ShapeDtypeStruct((num_cores, acc_rows, _LANE), jnp.float32),
        grid_spec=pltpu.PrefetchScalarGridSpec(
            num_scalar_prefetch=0,
            grid=(num_cores, steps_per_core),
            in_specs=[pl.BlockSpec((block_rows, _LANE), in_map)],
            # Lane-dense output; the same block is revisited across the reduction
            # axis, so it doubles as the per-core VMEM accumulator.
            out_specs=pl.BlockSpec((None, acc_rows, _LANE), lambda c, i: (c, 0, 0)),
        ),
        compiler_params=pltpu.CompilerParams(dimension_semantics=dim_sems),
    )(x2d)

    ksum = jnp.sum(partials)  # tiny final cross-lane/sublane reduce in plain JAX
    if tail_sum is not None:
        ksum = ksum + tail_sum
    return ksum / jnp.float32(total)


if __name__ == "__main__":
    key = jax.random.PRNGKey(0)
    # p_g: discriminator probabilities for generated samples, shape (B, C, H, W)
    p_g = jax.random.uniform(
        key, (2, 4, 16, 16), dtype=jnp.float32, minval=1e-3, maxval=1.0 - 1e-3
    )

    loss = jax.block_until_ready(generator_loss(p_g))

    # reference check (plain JAX, mirrors torch.mean(torch.log(1 - p_g)))
    ref = jnp.mean(jnp.log(1.0 - p_g))
    assert jnp.allclose(loss, ref, rtol=1e-5, atol=1e-6), (loss, ref)

    print("KERNEL_OK")
</pallas_src>

<mosaic_0001>
module attributes {stable_mosaic.version = 11 : i64} {
  func.func @_gen_loss_kernel(%arg0: i32, %arg1: i32, %arg2: memref<16x128xf32, #tpu.memory_space<vmem>>, %arg3: memref<1x16x128xf32, #tpu.memory_space<vmem>>) attributes {dimension_semantics = [#tpu.dimension_semantics<arbitrary>, #tpu.dimension_semantics<arbitrary>], iteration_bounds = array<i64: 1, 1>, scalar_prefetch = 0 : i64, scratch_operands = 0 : i64, tpu.core_type = #tpu.core_type<tc>, window_params = [{transform_indices = @transform_0, window_bounds = array<i64: 16, 128>}, {transform_indices = @transform_1, window_bounds = array<i64: 1, 16, 128>}]} {
    %c0_i32 = arith.constant 0 : i32
    %0 = arith.cmpi eq, %arg1, %c0_i32 : i32
    %1 = arith.extui %0 : i1 to i32
    %c0_i32_0 = arith.constant 0 : i32
    %2 = arith.cmpi ne, %1, %c0_i32_0 : i32
    scf.if %2 {
      %cst_9 = arith.constant 0.000000e+00 : f32
      %15 = vector.broadcast %cst_9 : f32 to vector<16x128xf32>
      %c0_10 = arith.constant 0 : index
      %c0_11 = arith.constant 0 : index
      %c0_12 = arith.constant 0 : index
      %16 = vector.load %arg3[%c0_10, %c0_11, %c0_12] : memref<1x16x128xf32, #tpu.memory_space<vmem>>, vector<1x16x128xf32>
      %17 = vector.shape_cast %16 : vector<1x16x128xf32> to vector<16x128xf32>
      %18 = vector.shape_cast %15 : vector<16x128xf32> to vector<1x16x128xf32>
      tpu.vector_store %arg3[%c0_10, %c0_11, %c0_12], %18 {strides = array<i32>} : memref<1x16x128xf32, #tpu.memory_space<vmem>>, vector<1x16x128xf32>,
    } else {
    }
    %c0 = arith.constant 0 : index
    %c0_1 = arith.constant 0 : index
    %3 = vector.load %arg2[%c0, %c0_1] : memref<16x128xf32, #tpu.memory_space<vmem>>, vector<16x128xf32>
    %cst = arith.constant 1.000000e+00 : f32
    %4 = vector.broadcast %cst : f32 to vector<16x128xf32>
    %5 = arith.subf %4, %3 : vector<16x128xf32>
    %6 = math.log %5 : vector<16x128xf32>
    %c0_2 = arith.constant 0 : index
    %c0_3 = arith.constant 0 : index
    %c0_4 = arith.constant 0 : index
    %7 = vector.load %arg3[%c0_2, %c0_3, %c0_4] : memref<1x16x128xf32, #tpu.memory_space<vmem>>, vector<1x16x128xf32>
    %8 = vector.shape_cast %7 : vector<1x16x128xf32> to vector<16x128xf32>
    %9 = vector.shape_cast %6 : vector<16x128xf32> to vector<1x16x128xf32>
    %cst_5 = arith.constant dense<0.000000e+00> : vector<16x128xf32>
    %10 = vector.multi_reduction <add>, %9, %cst_5 [0] : vector<1x16x128xf32> to vector<16x128xf32>
    %11 = arith.addf %8, %10 : vector<16x128xf32>
    %c0_6 = arith.constant 0 : index
    %c0_7 = arith.constant 0 : index
    %c0_8 = arith.constant 0 : index
    %12 = vector.load %arg3[%c0_6, %c0_7, %c0_8] : memref<1x16x128xf32, #tpu.memory_space<vmem>>, vector<1x16x128xf32>
    %13 = vector.shape_cast %12 : vector<1x16x128xf32> to vector<16x128xf32>
    %14 = vector.shape_cast %11 : vector<16x128xf32> to vector<1x16x128xf32>
    tpu.vector_store %arg3[%c0_6, %c0_7, %c0_8], %14 {strides = array<i32>} : memref<1x16x128xf32, #tpu.memory_space<vmem>>, vector<1x16x128xf32>,
    return
  }
  func.func @transform_0(%arg0: i32, %arg1: i32) -> (i32, i32) {
    %c1_i32 = arith.constant 1 : i32
    %0 = arith.muli %arg0, %c1_i32 : i32
    %1 = arith.addi %0, %arg1 : i32
    %c0_i32 = arith.constant 0 : i32
    %2 = arith.minsi %1, %c0_i32 : i32
    %c0_i32_0 = arith.constant 0 : i32
    %c0_i32_1 = arith.constant 0 : i32
    return %2, %c0_i32_0 : i32, i32
  }
  func.func @transform_1(%arg0: i32, %arg1: i32) -> (i32, i32, i32) {
    %c0_i32 = arith.constant 0 : i32
    %c0_i32_0 = arith.constant 0 : i32
    %c0_i32_1 = arith.constant 0 : i32
    return %arg0, %c0_i32, %c0_i32_0 : i32, i32, i32
  }
}

</mosaic_0001>

<bundles_post_ra>
// kernel: tpu_custom_call.1
= control target key start
LH: loop header
LB: loop body
LE: loop exit
PB: predicated region body
PF: predicated region fallthrough
CT: control target
= control target key end

     0   :  { %6 = vsyncpa [#allocation3], 0  ;;  %s175_s0 = inlined_call_operand.hbm [shape: f32[16,128], index: 0, kind: input, shape index: {}]   ;;  %s176_s1 = inlined_call_operand.hbm [shape: f32[1,16,128], index: 1, kind: output, shape index: {}]  }
   0x1   :  { %7 = vsyncpa [#allocation4], 0  ;;  %s131_s6 = smov [#allocation2]   ;;  %s83_s10 = scalar_lea.hbm %s175_s0, 256 }
   0x2   :  { %s19_s7 = sshll.u32 %s131_s6, 4  ;;  %p84_p0 = scmp.ne.s32.totalorder %s175_s0, %s83_s10  ;;  %s20_s7 = int_to_ptr.vmem [resolvable:$true] %s19_s7 }
   0x3   :  { %p87_p1 = scmp.lt.u32.totalorder %s83_s10, %s175_s0 }
   0x5   :  { %p89_p2 = pnand %p87_p1, %p84_p0 }
   0x7   :  { %92 = shalt.err (!%p89_p2)
}
   0x8   :  { %s93_s15 = scalar_lea.vmem %s20_s7, 256  ;;  %p98_p4 = scmp.lt.s32.totalorder %s20_s7, %s20_s7 }
   0x9   :  { %p94_p3 = scmp.ne.s32.totalorder %s20_s7, %s93_s15  ;;  %p99_p5 = scmp.lt.s32.totalorder %s93_s15, %s93_s15 }
   0xb   :  { %p100_p6 = por %p99_p5, %p98_p4 }
   0xd   :  { %p101_p7 = pnand %p100_p6, %p94_p3 }
   0xf   :  { %104 = shalt.err (!%p101_p7)
}
  0x10   :  { %s132_s16 = smov 128   ;;  %s133_s17 = smov 8  }
  0x11   :  { %25 = dma.hbm_to_vmem [thread:$0]  %s175_s0, 256, %s20_s7, [#allocation3], %s132_s16, %s132_s16, %s133_s17  }
  0x12   :  { %127 = dma.done.wait [#allocation3], 256  }
  0x13   :  { %128 = vsyncadd [#allocation3], 4294967040  ;;  %v39_v0 = vld [vmem:[#allocation2] sm:$0xff]  ;;  %v40_v1 = vld [vmem:[#allocation2 + $0x8] sm:$0xff]  ;;  %s134_s20 = smov [#allocation5]  }
  0x14   :  { %v41_v2 = vsub.f32 1.0, %v39_v0  ;;  %v42_v3 = vsub.f32 1.0, %v40_v1  ;;  %s60_s21 = sshll.u32 %s134_s20, 4  ;;  %s61_s21 = int_to_ptr.vmem [resolvable:$true] %s60_s21 }
  0x15   :  { %s105_s22 = scalar_lea.vmem %s61_s21, 256  ;;  %p110_p9 = scmp.lt.s32.totalorder %s61_s21, %s61_s21 }
  0x16   :  { %79 = vlog2.f32 %v41_v2  ;;  %p106_p8 = scmp.ne.s32.totalorder %s61_s21, %s105_s22  ;;  %p111_p10 = scmp.lt.s32.totalorder %s105_s22, %s105_s22 }
  0x17   :  { %81 = vlog2.f32 %v42_v3 }
  0x18   :  { %p112_p11 = por %p111_p10, %p110_p9 }
  0x1a   :  { %p113_p12 = pnand %p112_p11, %p106_p8 }
  0x20   :  { %v80_v4 = vpop.eup %79 }
  0x21   :  { %v82_v5 = vpop.eup %81  ;;  %v44_v6 = vmul.f32 0.6931472, %v80_v4 }
  0x22   :  { %v46_v7 = vmul.f32 0.6931472, %v82_v5 }
  0x23   :  { %53 = vst [vmem:[#allocation5] sm:$0xff] %v44_v6 }
  0x24   :  { %54 = vst [vmem:[#allocation5 + $0x8] sm:$0xff] %v46_v7 }
  0x25   :  { %116 = shalt.err (!%p113_p12)
}
  0x26   :  { %s117_s24 = scalar_lea.hbm %s176_s1, 256 }
  0x27   :  { %p118_p13 = scmp.ne.s32.totalorder %s176_s1, %s117_s24  ;;  %p121_p0 = scmp.lt.u32.totalorder %s117_s24, %s176_s1 }
  0x29   :  { %p123_p1 = pnand %p121_p0, %p118_p13 }
  0x2b   :  { %126 = shalt.err (!%p123_p1)
}
  0x2c   :  { %66 = dma.vmem_to_hbm [thread:$0]  %s61_s21, 256, %s176_s1, [#allocation4], %s132_s16, %s132_s16, %s133_s17  }
  0x2d   :  { %129 = dma.done.wait [#allocation4], 256  }
  0x2e   :  { %130 = vsyncadd [#allocation4], 4294967040 }
  0x2f   :  { %70 = vsyncpa [#allocation3], 1 }
  0x30   :  { %71 = vsyncpa [#allocation4], 1 }

</bundles_post_ra>
